<compile_context>
chip_gen: v6e
topology: v6e:2x2x1
jax: 0.10.0
libtpu: 0.0.40
codegen_flags: <defaults>
</compile_context>

<pallas_src>
import math

import jax
import jax.numpy as jnp
from jax import lax
from jax.experimental import pallas as pl
from jax.experimental.pallas import tpu as pltpu

# ---------------- config (small, consistent with the module) ----------------
BATCH = 2
SEQ = 8
HIDDEN = 32
N_HEADS = 4
HEAD_DIM = HIDDEN // N_HEADS
RMS_EPS = 1e-6
ROPE_THETA = 10000.0


# ----------------------- fused forward Pallas kernel ------------------------
def fused_attention_kernel(x_ref, wproj_ref, dproj_ref, wo_ref, dwo_ref,
                           cos_ref, sin_ref, o_ref):
    """One batch element per grid step: BitLinear QKV + RoPE + causal SDPA +
    BitLinear output projection, fully resident in VMEM/vregs."""
    H, D, S = HIDDEN, HEAD_DIM, SEQ
    x = x_ref[0].astype(jnp.float32)                          # (S, H)

    def rms_act_quant(t):
        # RMSNorm (unit gain) + BitNet per-row absmax 8-bit fake quant.
        # Returns integer-valued bf16 operand (exactly representable) and the
        # per-row dequant scale, so scales are applied AFTER the MXU matmul.
        ms = jnp.mean(t * t, axis=-1, keepdims=True)
        tn = t * lax.rsqrt(ms + RMS_EPS)
        a_max = jnp.clip(jnp.max(jnp.abs(tn), axis=-1, keepdims=True),
                         1e-5, None)
        t_int = jnp.clip(jnp.round(tn * (127.0 / a_max)), -128.0, 127.0)
        return t_int.astype(jnp.bfloat16), a_max * (1.0 / 127.0)

    # ---- fused [Q | Q_pairswap | K | K_pairswap | V] projection: one matmul ---
    x_int, x_deq = rms_act_quant(x)
    qkv = jnp.dot(x_int, wproj_ref[...],
                  preferred_element_type=jnp.float32)         # (S, 5H), exact ints
    qkv = qkv * x_deq * dproj_ref[...]                        # (S,1)*(1,5H) dequant

    q, q_sw = qkv[:, 0 * H:1 * H], qkv[:, 1 * H:2 * H]
    k, k_sw = qkv[:, 2 * H:3 * H], qkv[:, 3 * H:4 * H]
    v = qkv[:, 4 * H:5 * H]

    # ---- RoPE (interleaved real/imag layout). The even/odd pair swap was
    #      folded into the *_sw weight columns, so this is pure VPU mul/add. ---
    cos = cos_ref[...]                                        # (S, H)
    sin = sin_ref[...]                                        # (S, H), sign-folded
    q = q * cos + q_sw * sin
    k = k * cos + k_sw * sin

    # ---- causal multi-head attention (full S x S scores; S is tiny) ----------
    scale = 1.0 / math.sqrt(D)
    row = lax.broadcasted_iota(jnp.int32, (S, S), 0)
    col = lax.broadcasted_iota(jnp.int32, (S, S), 1)
    causal = col <= row
    heads = []
    for h in range(N_HEADS):                                  # static unroll
        lo, hi = h * D, (h + 1) * D
        qh, kh, vh = q[:, lo:hi], k[:, lo:hi], v[:, lo:hi]
        s = lax.dot_general(qh, kh, (((1,), (1,)), ((), ())),  # q @ k^T, no .T
                            preferred_element_type=jnp.float32) * scale
        s = jnp.where(causal, s, -1e30)
        m = jnp.max(s, axis=-1, keepdims=True)
        p = jnp.exp(s - m)
        p = p / jnp.sum(p, axis=-1, keepdims=True)
        heads.append(jnp.dot(p, vh, preferred_element_type=jnp.float32))
    attn = jnp.concatenate(heads, axis=-1)                    # (S, H)

    # ---- output projection (BitLinear wo) ------------------------------------
    a_int, a_deq = rms_act_quant(attn)
    out = jnp.dot(a_int, wo_ref[...], preferred_element_type=jnp.float32)
    out = out * a_deq * dwo_ref[...]
    o_ref[0] = out.astype(o_ref.dtype)


# --------------------------- host-side preparation ---------------------------
def _weight_quant_ternary(w):
    """BitNet absmean ternary quant: integer {-1,0,1} values + dequant scale."""
    deq = jnp.clip(jnp.mean(jnp.abs(w)), 1e-5, None)          # = 1 / w_scale
    w_int = jnp.clip(jnp.round(w / deq), -1.0, 1.0)
    return w_int, deq


def _rope_tables(seqlen):
    """Interleaved cos and sign-folded sin tables, tiled across heads: (S, H)."""
    freqs = 1.0 / (ROPE_THETA ** (jnp.arange(0, HEAD_DIM, 2, dtype=jnp.float32)
                                  / HEAD_DIM))
    ang = jnp.outer(jnp.arange(seqlen, dtype=jnp.float32), freqs)   # (S, D/2)
    cos = jnp.repeat(jnp.cos(ang), 2, axis=-1)                      # (S, D)
    sin = jnp.stack([-jnp.sin(ang), jnp.sin(ang)],
                    axis=-1).reshape(seqlen, HEAD_DIM)              # (S, D)
    return (jnp.tile(cos, (1, N_HEADS)).astype(jnp.float32),
            jnp.tile(sin, (1, N_HEADS)).astype(jnp.float32))


def attention_forward(x, wq, wk, wv, wo):
    B, S, H = x.shape

    # Precompute ternary weight quantization (weights are static) -- never
    # recompute the absmean scale / round / clip inside the kernel.
    wq_i, wq_d = _weight_quant_ternary(wq)
    wk_i, wk_d = _weight_quant_ternary(wk)
    wv_i, wv_d = _weight_quant_ternary(wv)
    wo_i, wo_d = _weight_quant_ternary(wo)

    # nn.Linear computes x @ w.T -> pass weights pre-transposed (H_in, H_out).
    wq_t, wk_t, wv_t, wo_t = wq_i.T, wk_i.T, wv_i.T, wo_i.T

    # Fold the RoPE even/odd pair swap (j <-> j^1 within each head) into extra
    # projection columns so the kernel never needs strided lane slices/rolls.
    idx = jnp.arange(H)
    perm = idx + 1 - 2 * (idx % 2)
    wproj = jnp.concatenate(
        [wq_t, wq_t[:, perm], wk_t, wk_t[:, perm], wv_t],
        axis=1).astype(jnp.bfloat16)                          # (H, 5H) ternary ints
    dproj = jnp.concatenate(
        [wq_d * jnp.ones((2 * H,), jnp.float32),
         wk_d * jnp.ones((2 * H,), jnp.float32),
         wv_d * jnp.ones((H,), jnp.float32)]).reshape(1, 5 * H)
    wo_tb = wo_t.astype(jnp.bfloat16)                         # (H, H) ternary ints
    dwo = wo_d * jnp.ones((1, H), jnp.float32)

    cos_full, sin_full = _rope_tables(S)

    return pl.pallas_call(
        fused_attention_kernel,
        out_shape=jax.ShapeDtypeStruct((B, S, H), x.dtype),
        grid=(B,),
        in_specs=[
            pl.BlockSpec((1, S, H), lambda b: (b, 0, 0)),     # x (per batch)
            pl.BlockSpec((H, 5 * H), lambda b: (0, 0)),       # fused qkv weights
            pl.BlockSpec((1, 5 * H), lambda b: (0, 0)),       # per-column dequant
            pl.BlockSpec((H, H), lambda b: (0, 0)),           # wo (pre-transposed)
            pl.BlockSpec((1, H), lambda b: (0, 0)),           # wo dequant
            pl.BlockSpec((S, H), lambda b: (0, 0)),           # RoPE cos
            pl.BlockSpec((S, H), lambda b: (0, 0)),           # RoPE sin (signed)
        ],
        out_specs=pl.BlockSpec((1, S, H), lambda b: (b, 0, 0)),
        compiler_params=pltpu.CompilerParams(
            dimension_semantics=("parallel",)),               # v7x: 2 TCs split B
    )(x, wproj, dproj, wo_tb, dwo, cos_full, sin_full)


# --------------------------- pure-JAX reference ------------------------------
def _reference_forward(x, wq, wk, wv, wo):
    """Plain-JAX mirror of the PyTorch module (f32 fake-quant formulation)."""
    def bitlinear(t2d, w):
        ms = jnp.mean(t2d * t2d, axis=-1, keepdims=True)
        tn = t2d * lax.rsqrt(ms + RMS_EPS)
        a_scale = 127.0 / jnp.clip(
            jnp.max(jnp.abs(tn), axis=-1, keepdims=True), 1e-5, None)
        t_q = jnp.clip(jnp.round(tn * a_scale), -128.0, 127.0) / a_scale
        w_scale = 1.0 / jnp.clip(jnp.mean(jnp.abs(w)), 1e-5, None)
        w_q = jnp.clip(jnp.round(w * w_scale), -1.0, 1.0) / w_scale
        return jnp.dot(t_q, w_q.T, precision=lax.Precision.HIGHEST)

    B, S, H = x.shape
    x2d = x.reshape(B * S, H)
    q = bitlinear(x2d, wq).reshape(B, S, N_HEADS, HEAD_DIM)
    k = bitlinear(x2d, wk).reshape(B, S, N_HEADS, HEAD_DIM)
    v = bitlinear(x2d, wv).reshape(B, S, N_HEADS, HEAD_DIM)

    freqs = 1.0 / (ROPE_THETA ** (jnp.arange(0, HEAD_DIM, 2, dtype=jnp.float32)
                                  / HEAD_DIM))
    ang = jnp.outer(jnp.arange(S, dtype=jnp.float32), freqs)
    cos, sin = jnp.cos(ang), jnp.sin(ang)

    def rope(t):
        tr, ti = t[..., 0::2], t[..., 1::2]
        c, s = cos[None, :, None, :], sin[None, :, None, :]
        return jnp.stack([tr * c - ti * s, tr * s + ti * c],
                         axis=-1).reshape(t.shape)

    q, k = rope(q), rope(k)
    q = jnp.transpose(q, (0, 2, 1, 3))
    k = jnp.transpose(k, (0, 2, 1, 3))
    v = jnp.transpose(v, (0, 2, 1, 3))
    s = jnp.einsum("bhqd,bhkd->bhqk", q, k,
                   precision=lax.Precision.HIGHEST) / math.sqrt(HEAD_DIM)
    mask = jnp.tril(jnp.ones((S, S), dtype=bool))
    s = jnp.where(mask, s, -jnp.inf)
    p = jax.nn.softmax(s, axis=-1)
    o = jnp.einsum("bhqk,bhkd->bhqd", p, v, precision=lax.Precision.HIGHEST)
    o = jnp.transpose(o, (0, 2, 1, 3)).reshape(B * S, H)
    return bitlinear(o, wo).reshape(B, S, H)


# ----------------------------------- main ------------------------------------
if __name__ == "__main__":
    key = jax.random.PRNGKey(0)
    kx, kq, kk, kv, ko = jax.random.split(key, 5)

    x = jax.random.normal(kx, (BATCH, SEQ, HIDDEN), dtype=jnp.float32)

    # nn.Linear-style deterministic init: U(-1/sqrt(fan_in), 1/sqrt(fan_in))
    bound = 1.0 / math.sqrt(HIDDEN)
    wq = jax.random.uniform(kq, (HIDDEN, HIDDEN), jnp.float32, -bound, bound)
    wk = jax.random.uniform(kk, (HIDDEN, HIDDEN), jnp.float32, -bound, bound)
    wv = jax.random.uniform(kv, (HIDDEN, HIDDEN), jnp.float32, -bound, bound)
    wo = jax.random.uniform(ko, (HIDDEN, HIDDEN), jnp.float32, -bound, bound)

    out = jax.jit(attention_forward)(x, wq, wk, wv, wo)
    jax.block_until_ready(out)

    assert out.shape == (BATCH, SEQ, HIDDEN) and out.dtype == jnp.float32
    assert bool(jnp.all(jnp.isfinite(out)))

    # Sanity check vs. the pure-JAX reference (loose tolerance: the kernel
    # applies quant scales post-matmul, mathematically identical but not
    # bit-identical to the pre-scaled f32 fake-quant formulation).
    ref = _reference_forward(x, wq, wk, wv, wo)
    max_err = float(jnp.max(jnp.abs(out - ref)))
    assert max_err < 5e-2, f"kernel/reference mismatch: {max_err}"

    print("KERNEL_OK")
</pallas_src>

<mosaic_0001>
module attributes {stable_mosaic.version = 11 : i64} {
  func.func @fused_attention_kernel(%arg0: i32, %arg1: memref<1x8x32xf32, #tpu.memory_space<vmem>>, %arg2: memref<32x160xbf16, #tpu.memory_space<vmem>>, %arg3: memref<1x160xf32, #tpu.memory_space<vmem>>, %arg4: memref<32x32xbf16, #tpu.memory_space<vmem>>, %arg5: memref<1x32xf32, #tpu.memory_space<vmem>>, %arg6: memref<8x32xf32, #tpu.memory_space<vmem>>, %arg7: memref<8x32xf32, #tpu.memory_space<vmem>>, %arg8: memref<1x8x32xf32, #tpu.memory_space<vmem>>) attributes {dimension_semantics = [#tpu.dimension_semantics<parallel>], iteration_bounds = array<i64: 2>, scalar_prefetch = 0 : i64, scratch_operands = 0 : i64, tpu.core_type = #tpu.core_type<tc>, window_params = [{transform_indices = @transform_0, window_bounds = array<i64: 1, 8, 32>}, {pipeline_mode = #tpu.pipeline_mode<synchronous>, transform_indices = @transform_1, window_bounds = array<i64: 32, 160>}, {pipeline_mode = #tpu.pipeline_mode<synchronous>, transform_indices = @transform_2, window_bounds = array<i64: 1, 160>}, {pipeline_mode = #tpu.pipeline_mode<synchronous>, transform_indices = @transform_3, window_bounds = array<i64: 32, 32>}, {pipeline_mode = #tpu.pipeline_mode<synchronous>, transform_indices = @transform_4, window_bounds = array<i64: 1, 32>}, {pipeline_mode = #tpu.pipeline_mode<synchronous>, transform_indices = @transform_5, window_bounds = array<i64: 8, 32>}, {pipeline_mode = #tpu.pipeline_mode<synchronous>, transform_indices = @transform_6, window_bounds = array<i64: 8, 32>}, {transform_indices = @transform_7, window_bounds = array<i64: 1, 8, 32>}]} {
    %c0 = arith.constant 0 : index
    %c0_0 = arith.constant 0 : index
    %c0_1 = arith.constant 0 : index
    %0 = vector.load %arg1[%c0, %c0_0, %c0_1] : memref<1x8x32xf32, #tpu.memory_space<vmem>>, vector<1x8x32xf32>
    %1 = vector.shape_cast %0 : vector<1x8x32xf32> to vector<8x32xf32>
    %2 = arith.mulf %1, %1 : vector<8x32xf32>
    %cst = arith.constant dense<0.000000e+00> : vector<8xf32>
    %3 = vector.multi_reduction <add>, %2, %cst [1] : vector<8x32xf32> to vector<8xf32>
    %4 = vector.shape_cast %3 : vector<8xf32> to vector<8x1xf32>
    %cst_2 = arith.constant 3.200000e+01 : f32
    %5 = vector.broadcast %cst_2 : f32 to vector<8x1xf32>
    %6 = arith.divf %4, %5 : vector<8x1xf32>
    %cst_3 = arith.constant 9.99999997E-7 : f32
    %7 = vector.broadcast %cst_3 : f32 to vector<8x1xf32>
    %8 = arith.addf %6, %7 : vector<8x1xf32>
    %9 = math.rsqrt %8 : vector<8x1xf32>
    %10 = vector.broadcast %9 : vector<8x1xf32> to vector<8x32xf32>
    %11 = arith.mulf %1, %10 : vector<8x32xf32>
    %12 = math.absf %11 : vector<8x32xf32>
    %cst_4 = arith.constant dense<0xFF800000> : vector<8xf32>
    %13 = vector.multi_reduction <maximumf>, %12, %cst_4 [1] : vector<8x32xf32> to vector<8xf32>
    %14 = vector.shape_cast %13 : vector<8xf32> to vector<8x1xf32>
    %cst_5 = arith.constant 9.99999974E-6 : f32
    %15 = vector.broadcast %cst_5 : f32 to vector<8x1xf32>
    %16 = arith.maximumf %15, %14 : vector<8x1xf32>
    %cst_6 = arith.constant 1.270000e+02 : f32
    %17 = vector.broadcast %cst_6 : f32 to vector<8x1xf32>
    %18 = arith.divf %17, %16 : vector<8x1xf32>
    %19 = vector.broadcast %18 : vector<8x1xf32> to vector<8x32xf32>
    %20 = arith.mulf %11, %19 : vector<8x32xf32>
    %21 = math.roundeven %20 : vector<8x32xf32>
    %cst_7 = arith.constant -1.280000e+02 : f32
    %cst_8 = arith.constant 1.270000e+02 : f32
    %22 = vector.broadcast %cst_7 : f32 to vector<8x32xf32>
    %23 = arith.maximumf %22, %21 : vector<8x32xf32>
    %24 = vector.broadcast %cst_8 : f32 to vector<8x32xf32>
    %25 = arith.minimumf %24, %23 : vector<8x32xf32>
    %26 = arith.truncf %25 : vector<8x32xf32> to vector<8x32xbf16>
    %cst_9 = arith.constant 0.00787401571 : f32
    %27 = vector.broadcast %cst_9 : f32 to vector<8x1xf32>
    %28 = arith.mulf %16, %27 : vector<8x1xf32>
    %c0_10 = arith.constant 0 : index
    %c0_11 = arith.constant 0 : index
    %29 = vector.load %arg2[%c0_10, %c0_11] : memref<32x160xbf16, #tpu.memory_space<vmem>>, vector<32x160xbf16>
    %cst_12 = arith.constant dense<0.000000e+00> : vector<8x160xf32>
    %30 = tpu.matmul %26, %29, %cst_12 {dimension_numbers = #tpu.dot_dimension_numbers<[1], [0], [0], [1], [0, 0, 1, 1], [], []>} : vector<8x32xbf16>, vector<32x160xbf16>, vector<8x160xf32> -> vector<8x160xf32>
    %31 = vector.broadcast %28 : vector<8x1xf32> to vector<8x160xf32>
    %32 = arith.mulf %30, %31 : vector<8x160xf32>
    %c0_13 = arith.constant 0 : index
    %c0_14 = arith.constant 0 : index
    %33 = vector.load %arg3[%c0_13, %c0_14] : memref<1x160xf32, #tpu.memory_space<vmem>>, vector<1x160xf32>
    %34 = vector.broadcast %33 : vector<1x160xf32> to vector<8x160xf32>
    %35 = arith.mulf %32, %34 : vector<8x160xf32>
    %36 = vector.extract_strided_slice %35 {offsets = [0, 0], sizes = [8, 32], strides = [1, 1]} : vector<8x160xf32> to vector<8x32xf32>
    %37 = vector.extract_strided_slice %35 {offsets = [0, 32], sizes = [8, 32], strides = [1, 1]} : vector<8x160xf32> to vector<8x32xf32>
    %38 = vector.extract_strided_slice %35 {offsets = [0, 64], sizes = [8, 32], strides = [1, 1]} : vector<8x160xf32> to vector<8x32xf32>
    %39 = vector.extract_strided_slice %35 {offsets = [0, 96], sizes = [8, 32], strides = [1, 1]} : vector<8x160xf32> to vector<8x32xf32>
    %40 = vector.extract_strided_slice %35 {offsets = [0, 128], sizes = [8, 32], strides = [1, 1]} : vector<8x160xf32> to vector<8x32xf32>
    %c0_15 = arith.constant 0 : index
    %c0_16 = arith.constant 0 : index
    %41 = vector.load %arg6[%c0_15, %c0_16] : memref<8x32xf32, #tpu.memory_space<vmem>>, vector<8x32xf32>
    %c0_17 = arith.constant 0 : index
    %c0_18 = arith.constant 0 : index
    %42 = vector.load %arg7[%c0_17, %c0_18] : memref<8x32xf32, #tpu.memory_space<vmem>>, vector<8x32xf32>
    %43 = arith.mulf %36, %41 : vector<8x32xf32>
    %44 = arith.mulf %37, %42 : vector<8x32xf32>
    %45 = arith.addf %43, %44 : vector<8x32xf32>
    %46 = arith.mulf %38, %41 : vector<8x32xf32>
    %47 = arith.mulf %39, %42 : vector<8x32xf32>
    %48 = arith.addf %46, %47 : vector<8x32xf32>
    %49 = tpu.iota {dimensions = array<i32: 0>} : vector<8x8xi32>
    %50 = tpu.iota {dimensions = array<i32: 1>} : vector<8x8xi32>
    %51 = arith.cmpi sle, %50, %49 : vector<8x8xi32>
    %52 = vector.extract_strided_slice %45 {offsets = [0, 0], sizes = [8, 8], strides = [1, 1]} : vector<8x32xf32> to vector<8x8xf32>
    %53 = vector.extract_strided_slice %48 {offsets = [0, 0], sizes = [8, 8], strides = [1, 1]} : vector<8x32xf32> to vector<8x8xf32>
    %54 = vector.extract_strided_slice %40 {offsets = [0, 0], sizes = [8, 8], strides = [1, 1]} : vector<8x32xf32> to vector<8x8xf32>
    %cst_19 = arith.constant dense<0.000000e+00> : vector<8x8xf32>
    %55 = tpu.matmul %52, %53, %cst_19 {dimension_numbers = #tpu.dot_dimension_numbers<[1], [1], [0], [0], [0, 0, 1, 0], [], []>} : vector<8x8xf32>, vector<8x8xf32>, vector<8x8xf32> -> vector<8x8xf32>
    %cst_20 = arith.constant 0.353553385 : f32
    %56 = vector.broadcast %cst_20 : f32 to vector<8x8xf32>
    %57 = arith.mulf %55, %56 : vector<8x8xf32>
    %cst_21 = arith.constant -1.000000e+30 : f32
    %58 = vector.broadcast %cst_21 : f32 to vector<8x8xf32>
    %59 = arith.select %51, %57, %58 : vector<8x8xi1>, vector<8x8xf32>
    %cst_22 = arith.constant dense<0xFF800000> : vector<8xf32>
    %60 = vector.multi_reduction <maximumf>, %59, %cst_22 [1] : vector<8x8xf32> to vector<8xf32>
    %61 = vector.shape_cast %60 : vector<8xf32> to vector<8x1xf32>
    %62 = vector.broadcast %61 : vector<8x1xf32> to vector<8x8xf32>
    %63 = arith.subf %59, %62 : vector<8x8xf32>
    %64 = math.exp %63 : vector<8x8xf32>
    %cst_23 = arith.constant dense<0.000000e+00> : vector<8xf32>
    %65 = vector.multi_reduction <add>, %64, %cst_23 [1] : vector<8x8xf32> to vector<8xf32>
    %66 = vector.shape_cast %65 : vector<8xf32> to vector<8x1xf32>
    %67 = vector.broadcast %66 : vector<8x1xf32> to vector<8x8xf32>
    %68 = arith.divf %64, %67 : vector<8x8xf32>
    %cst_24 = arith.constant dense<0.000000e+00> : vector<8x8xf32>
    %69 = tpu.matmul %68, %54, %cst_24 {dimension_numbers = #tpu.dot_dimension_numbers<[1], [0], [0], [1], [0, 0, 1, 1], [], []>} : vector<8x8xf32>, vector<8x8xf32>, vector<8x8xf32> -> vector<8x8xf32>
    %70 = vector.extract_strided_slice %45 {offsets = [0, 8], sizes = [8, 8], strides = [1, 1]} : vector<8x32xf32> to vector<8x8xf32>
    %71 = vector.extract_strided_slice %48 {offsets = [0, 8], sizes = [8, 8], strides = [1, 1]} : vector<8x32xf32> to vector<8x8xf32>
    %72 = vector.extract_strided_slice %40 {offsets = [0, 8], sizes = [8, 8], strides = [1, 1]} : vector<8x32xf32> to vector<8x8xf32>
    %cst_25 = arith.constant dense<0.000000e+00> : vector<8x8xf32>
    %73 = tpu.matmul %70, %71, %cst_25 {dimension_numbers = #tpu.dot_dimension_numbers<[1], [1], [0], [0], [0, 0, 1, 0], [], []>} : vector<8x8xf32>, vector<8x8xf32>, vector<8x8xf32> -> vector<8x8xf32>
    %cst_26 = arith.constant 0.353553385 : f32
    %74 = vector.broadcast %cst_26 : f32 to vector<8x8xf32>
    %75 = arith.mulf %73, %74 : vector<8x8xf32>
    %cst_27 = arith.constant -1.000000e+30 : f32
    %76 = vector.broadcast %cst_27 : f32 to vector<8x8xf32>
    %77 = arith.select %51, %75, %76 : vector<8x8xi1>, vector<8x8xf32>
    %cst_28 = arith.constant dense<0xFF800000> : vector<8xf32>
    %78 = vector.multi_reduction <maximumf>, %77, %cst_28 [1] : vector<8x8xf32> to vector<8xf32>
    %79 = vector.shape_cast %78 : vector<8xf32> to vector<8x1xf32>
    %80 = vector.broadcast %79 : vector<8x1xf32> to vector<8x8xf32>
    %81 = arith.subf %77, %80 : vector<8x8xf32>
    %82 = math.exp %81 : vector<8x8xf32>
    %cst_29 = arith.constant dense<0.000000e+00> : vector<8xf32>
    %83 = vector.multi_reduction <add>, %82, %cst_29 [1] : vector<8x8xf32> to vector<8xf32>
    %84 = vector.shape_cast %83 : vector<8xf32> to vector<8x1xf32>
    %85 = vector.broadcast %84 : vector<8x1xf32> to vector<8x8xf32>
    %86 = arith.divf %82, %85 : vector<8x8xf32>
    %cst_30 = arith.constant dense<0.000000e+00> : vector<8x8xf32>
    %87 = tpu.matmul %86, %72, %cst_30 {dimension_numbers = #tpu.dot_dimension_numbers<[1], [0], [0], [1], [0, 0, 1, 1], [], []>} : vector<8x8xf32>, vector<8x8xf32>, vector<8x8xf32> -> vector<8x8xf32>
    %88 = vector.extract_strided_slice %45 {offsets = [0, 16], sizes = [8, 8], strides = [1, 1]} : vector<8x32xf32> to vector<8x8xf32>
    %89 = vector.extract_strided_slice %48 {offsets = [0, 16], sizes = [8, 8], strides = [1, 1]} : vector<8x32xf32> to vector<8x8xf32>
    %90 = vector.extract_strided_slice %40 {offsets = [0, 16], sizes = [8, 8], strides = [1, 1]} : vector<8x32xf32> to vector<8x8xf32>
    %cst_31 = arith.constant dense<0.000000e+00> : vector<8x8xf32>
    %91 = tpu.matmul %88, %89, %cst_31 {dimension_numbers = #tpu.dot_dimension_numbers<[1], [1], [0], [0], [0, 0, 1, 0], [], []>} : vector<8x8xf32>, vector<8x8xf32>, vector<8x8xf32> -> vector<8x8xf32>
    %cst_32 = arith.constant 0.353553385 : f32
    %92 = vector.broadcast %cst_32 : f32 to vector<8x8xf32>
    %93 = arith.mulf %91, %92 : vector<8x8xf32>
    %cst_33 = arith.constant -1.000000e+30 : f32
    %94 = vector.broadcast %cst_33 : f32 to vector<8x8xf32>
    %95 = arith.select %51, %93, %94 : vector<8x8xi1>, vector<8x8xf32>
    %cst_34 = arith.constant dense<0xFF800000> : vector<8xf32>
    %96 = vector.multi_reduction <maximumf>, %95, %cst_34 [1] : vector<8x8xf32> to vector<8xf32>
    %97 = vector.shape_cast %96 : vector<8xf32> to vector<8x1xf32>
    %98 = vector.broadcast %97 : vector<8x1xf32> to vector<8x8xf32>
    %99 = arith.subf %95, %98 : vector<8x8xf32>
    %100 = math.exp %99 : vector<8x8xf32>
    %cst_35 = arith.constant dense<0.000000e+00> : vector<8xf32>
    %101 = vector.multi_reduction <add>, %100, %cst_35 [1] : vector<8x8xf32> to vector<8xf32>
    %102 = vector.shape_cast %101 : vector<8xf32> to vector<8x1xf32>
    %103 = vector.broadcast %102 : vector<8x1xf32> to vector<8x8xf32>
    %104 = arith.divf %100, %103 : vector<8x8xf32>
    %cst_36 = arith.constant dense<0.000000e+00> : vector<8x8xf32>
    %105 = tpu.matmul %104, %90, %cst_36 {dimension_numbers = #tpu.dot_dimension_numbers<[1], [0], [0], [1], [0, 0, 1, 1], [], []>} : vector<8x8xf32>, vector<8x8xf32>, vector<8x8xf32> -> vector<8x8xf32>
    %106 = vector.extract_strided_slice %45 {offsets = [0, 24], sizes = [8, 8], strides = [1, 1]} : vector<8x32xf32> to vector<8x8xf32>
    %107 = vector.extract_strided_slice %48 {offsets = [0, 24], sizes = [8, 8], strides = [1, 1]} : vector<8x32xf32> to vector<8x8xf32>
    %108 = vector.extract_strided_slice %40 {offsets = [0, 24], sizes = [8, 8], strides = [1, 1]} : vector<8x32xf32> to vector<8x8xf32>
    %cst_37 = arith.constant dense<0.000000e+00> : vector<8x8xf32>
    %109 = tpu.matmul %106, %107, %cst_37 {dimension_numbers = #tpu.dot_dimension_numbers<[1], [1], [0], [0], [0, 0, 1, 0], [], []>} : vector<8x8xf32>, vector<8x8xf32>, vector<8x8xf32> -> vector<8x8xf32>
    %cst_38 = arith.constant 0.353553385 : f32
    %110 = vector.broadcast %cst_38 : f32 to vector<8x8xf32>
    %111 = arith.mulf %109, %110 : vector<8x8xf32>
    %cst_39 = arith.constant -1.000000e+30 : f32
    %112 = vector.broadcast %cst_39 : f32 to vector<8x8xf32>
    %113 = arith.select %51, %111, %112 : vector<8x8xi1>, vector<8x8xf32>
    %cst_40 = arith.constant dense<0xFF800000> : vector<8xf32>
    %114 = vector.multi_reduction <maximumf>, %113, %cst_40 [1] : vector<8x8xf32> to vector<8xf32>
    %115 = vector.shape_cast %114 : vector<8xf32> to vector<8x1xf32>
    %116 = vector.broadcast %115 : vector<8x1xf32> to vector<8x8xf32>
    %117 = arith.subf %113, %116 : vector<8x8xf32>
    %118 = math.exp %117 : vector<8x8xf32>
    %cst_41 = arith.constant dense<0.000000e+00> : vector<8xf32>
    %119 = vector.multi_reduction <add>, %118, %cst_41 [1] : vector<8x8xf32> to vector<8xf32>
    %120 = vector.shape_cast %119 : vector<8xf32> to vector<8x1xf32>
    %121 = vector.broadcast %120 : vector<8x1xf32> to vector<8x8xf32>
    %122 = arith.divf %118, %121 : vector<8x8xf32>
    %cst_42 = arith.constant dense<0.000000e+00> : vector<8x8xf32>
    %123 = tpu.matmul %122, %108, %cst_42 {dimension_numbers = #tpu.dot_dimension_numbers<[1], [0], [0], [1], [0, 0, 1, 1], [], []>} : vector<8x8xf32>, vector<8x8xf32>, vector<8x8xf32> -> vector<8x8xf32>
    %124 = tpu.concatenate %69, %87, %105, %123 in 1 : vector<8x8xf32>, vector<8x8xf32>, vector<8x8xf32>, vector<8x8xf32> -> vector<8x32xf32>
    %125 = arith.mulf %124, %124 : vector<8x32xf32>
    %cst_43 = arith.constant dense<0.000000e+00> : vector<8xf32>
    %126 = vector.multi_reduction <add>, %125, %cst_43 [1] : vector<8x32xf32> to vector<8xf32>
    %127 = vector.shape_cast %126 : vector<8xf32> to vector<8x1xf32>
    %cst_44 = arith.constant 3.200000e+01 : f32
    %128 = vector.broadcast %cst_44 : f32 to vector<8x1xf32>
    %129 = arith.divf %127, %128 : vector<8x1xf32>
    %cst_45 = arith.constant 9.99999997E-7 : f32
    %130 = vector.broadcast %cst_45 : f32 to vector<8x1xf32>
    %131 = arith.addf %129, %130 : vector<8x1xf32>
    %132 = math.rsqrt %131 : vector<8x1xf32>
    %133 = vector.broadcast %132 : vector<8x1xf32> to vector<8x32xf32>
    %134 = arith.mulf %124, %133 : vector<8x32xf32>
    %135 = math.absf %134 : vector<8x32xf32>
    %cst_46 = arith.constant dense<0xFF800000> : vector<8xf32>
    %136 = vector.multi_reduction <maximumf>, %135, %cst_46 [1] : vector<8x32xf32> to vector<8xf32>
    %137 = vector.shape_cast %136 : vector<8xf32> to vector<8x1xf32>
    %cst_47 = arith.constant 9.99999974E-6 : f32
    %138 = vector.broadcast %cst_47 : f32 to vector<8x1xf32>
    %139 = arith.maximumf %138, %137 : vector<8x1xf32>
    %cst_48 = arith.constant 1.270000e+02 : f32
    %140 = vector.broadcast %cst_48 : f32 to vector<8x1xf32>
    %141 = arith.divf %140, %139 : vector<8x1xf32>
    %142 = vector.broadcast %141 : vector<8x1xf32> to vector<8x32xf32>
    %143 = arith.mulf %134, %142 : vector<8x32xf32>
    %144 = math.roundeven %143 : vector<8x32xf32>
    %cst_49 = arith.constant -1.280000e+02 : f32
    %cst_50 = arith.constant 1.270000e+02 : f32
    %145 = vector.broadcast %cst_49 : f32 to vector<8x32xf32>
    %146 = arith.maximumf %145, %144 : vector<8x32xf32>
    %147 = vector.broadcast %cst_50 : f32 to vector<8x32xf32>
    %148 = arith.minimumf %147, %146 : vector<8x32xf32>
    %149 = arith.truncf %148 : vector<8x32xf32> to vector<8x32xbf16>
    %cst_51 = arith.constant 0.00787401571 : f32
    %150 = vector.broadcast %cst_51 : f32 to vector<8x1xf32>
    %151 = arith.mulf %139, %150 : vector<8x1xf32>
    %c0_52 = arith.constant 0 : index
    %c0_53 = arith.constant 0 : index
    %152 = vector.load %arg4[%c0_52, %c0_53] : memref<32x32xbf16, #tpu.memory_space<vmem>>, vector<32x32xbf16>
    %cst_54 = arith.constant dense<0.000000e+00> : vector<8x32xf32>
    %153 = tpu.matmul %149, %152, %cst_54 {dimension_numbers = #tpu.dot_dimension_numbers<[1], [0], [0], [1], [0, 0, 1, 1], [], []>} : vector<8x32xbf16>, vector<32x32xbf16>, vector<8x32xf32> -> vector<8x32xf32>
    %154 = vector.broadcast %151 : vector<8x1xf32> to vector<8x32xf32>
    %155 = arith.mulf %153, %154 : vector<8x32xf32>
    %c0_55 = arith.constant 0 : index
    %c0_56 = arith.constant 0 : index
    %156 = vector.load %arg5[%c0_55, %c0_56] : memref<1x32xf32, #tpu.memory_space<vmem>>, vector<1x32xf32>
    %157 = vector.broadcast %156 : vector<1x32xf32> to vector<8x32xf32>
    %158 = arith.mulf %155, %157 : vector<8x32xf32>
    %c0_57 = arith.constant 0 : index
    %c0_58 = arith.constant 0 : index
    %c0_59 = arith.constant 0 : index
    %159 = vector.load %arg8[%c0_57, %c0_58, %c0_59] : memref<1x8x32xf32, #tpu.memory_space<vmem>>, vector<1x8x32xf32>
    %160 = vector.shape_cast %159 : vector<1x8x32xf32> to vector<8x32xf32>
    %161 = vector.shape_cast %158 : vector<8x32xf32> to vector<1x8x32xf32>
    tpu.vector_store %arg8[%c0_57, %c0_58, %c0_59], %161 {strides = array<i32>} : memref<1x8x32xf32, #tpu.memory_space<vmem>>, vector<1x8x32xf32>,
    return
  }
  func.func @transform_0(%arg0: i32) -> (i32, i32, i32) {
    %c0_i32 = arith.constant 0 : i32
    %c0_i32_0 = arith.constant 0 : i32
    %c0_i32_1 = arith.constant 0 : i32
    return %arg0, %c0_i32, %c0_i32_0 : i32, i32, i32
  }
  func.func @transform_1(%arg0: i32) -> (i32, i32) {
    %c0_i32 = arith.constant 0 : i32
    %c0_i32_0 = arith.constant 0 : i32
    %c0_i32_1 = arith.constant 0 : i32
    return %c0_i32, %c0_i32_0 : i32, i32
  }
  func.func @transform_2(%arg0: i32) -> (i32, i32) {
    %c0_i32 = arith.constant 0 : i32
    %c0_i32_0 = arith.constant 0 : i32
    %c0_i32_1 = arith.constant 0 : i32
    return %c0_i32, %c0_i32_0 : i32, i32
  }
  func.func @transform_3(%arg0: i32) -> (i32, i32) {
    %c0_i32 = arith.constant 0 : i32
    %c0_i32_0 = arith.constant 0 : i32
    %c0_i32_1 = arith.constant 0 : i32
    return %c0_i32, %c0_i32_0 : i32, i32
  }
  func.func @transform_4(%arg0: i32) -> (i32, i32) {
    %c0_i32 = arith.constant 0 : i32
    %c0_i32_0 = arith.constant 0 : i32
    %c0_i32_1 = arith.constant 0 : i32
    return %c0_i32, %c0_i32_0 : i32, i32
  }
  func.func @transform_5(%arg0: i32) -> (i32, i32) {
    %c0_i32 = arith.constant 0 : i32
    %c0_i32_0 = arith.constant 0 : i32
    %c0_i32_1 = arith.constant 0 : i32
    return %c0_i32, %c0_i32_0 : i32, i32
  }
  func.func @transform_6(%arg0: i32) -> (i32, i32) {
    %c0_i32 = arith.constant 0 : i32
    %c0_i32_0 = arith.constant 0 : i32
    %c0_i32_1 = arith.constant 0 : i32
    return %c0_i32, %c0_i32_0 : i32, i32
  }
  func.func @transform_7(%arg0: i32) -> (i32, i32, i32) {
    %c0_i32 = arith.constant 0 : i32
    %c0_i32_0 = arith.constant 0 : i32
    %c0_i32_1 = arith.constant 0 : i32
    return %arg0, %c0_i32, %c0_i32_0 : i32, i32, i32
  }
}

</mosaic_0001>

<bundles_post_ra>
// kernel: mul.16
= control target key start
LH: loop header
LB: loop body
LE: loop exit
PB: predicated region body
PF: predicated region fallthrough
CT: control target
= control target key end

     0   :  { %s20_s0 = inlined_call_operand.<no memory space> [shape: f32[], index: 0, kind: input, shape index: {}]   ;;  %s21_s1 = inlined_call_operand.vmem [shape: f32[64], index: 1, kind: output, shape index: {}]  }
   0x1   :  { %v2_v0 = vstv %s20_s0 }
   0x2   :  { %3 = vst [vmem:[%s21_s1] sm:$0x1] %v2_v0 }

// kernel: tile.15
= control target key start
LH: loop header
LB: loop body
LE: loop exit
PB: predicated region body
PF: predicated region fallthrough
CT: control target
= control target key end

     0   :  { %vm43_vm0 = vcmask 1047556   ;;  %vm45_vm1 = vcmask 64512   ;;  %s94_s22 = smov 8   ;;  %s95_s25 = smov 16   ;;  %vm55_vm2 = vcmask 261312   ;;  %vm65_vm3 = vcmask 195712   ;;  %s147_s0 = inlined_call_operand.vmem [shape: f32[8,4,8], index: 0, kind: input, shape index: {}]   ;;  %s148_s1 = inlined_call_operand.vmem [shape: f32[8,32], index: 1, kind: output, shape index: {}]  }
   0x1   :  { %v83_v0 = vld [vmem:[%s147_s0 + $0x1c] sm:$0xf]  ;;  %v84_v1 = vld [vmem:[%s147_s0 + $0x18] sm:$0xf]  ;;  %v85_v2 = vld [vmem:[%s147_s0 + $0x14] sm:$0xf] }
   0x2   :  { %9 = vst [vmem:[#allocation0 + $0x38] sm:$0xf] %v83_v0  ;;  %14 = vst [vmem:[#allocation0 + $0x30] sm:$0xf] %v84_v1  ;;  %v86_v3 = vld [vmem:[%s147_s0 + $0x10] sm:$0xf] }
   0x3   :  { %19 = vst [vmem:[#allocation0 + $0x28] sm:$0xf] %v85_v2  ;;  %v87_v4 = vld [vmem:[%s147_s0 + $0xc] sm:$0xf]  ;;  %v88_v5 = vld [vmem:[%s147_s0 + $0x8] sm:$0xf] }
   0x4   :  { %24 = vst [vmem:[#allocation0 + $0x20] sm:$0xf] %v86_v3  ;;  %29 = vst [vmem:[#allocation0 + $0x18] sm:$0xf] %v87_v4  ;;  %v89_v6 = vld [vmem:[%s147_s0 + $0x4] sm:$0xf] }
   0x5   :  { %34 = vst [vmem:[#allocation0 + $0x10] sm:$0xf] %v88_v5  ;;  %v39_v7 = vld [vmem:[%s147_s0] sm:$0xf]  ;;  %38 = vst [vmem:[#allocation0 + $0x8] sm:$0xf] %v89_v6 }
   0x6   :  { %40 = vst [vmem:[#allocation0] sm:$0xf] %v39_v7  ;;  %s93_s0 = smov 24   ;;  %vm75_vm4 = vcmask 130112  }
   0xb   :  { %v50_v8 = vld [vmem:[#allocation0 + $0x3] ss:$8 sm:$0xf0]   ;;  %v60_v9 = vld [vmem:[#allocation0 + $0x2] ss:$8 sm:$0xf0]  }
   0xc   :  { %v70_v14 = vld [vmem:[#allocation0 + $0x1] ss:$8 sm:$0xf0]   ;;  %v42_v17 = vld [vmem:[#allocation0] ss:$8 sm:$0xf0]  }
   0xd   :  { %v48_v10 = vld [vmem:[#allocation0 + $0x3] ss:$8 sm:$0xf]   ;;  %v58_v11 = vld [vmem:[#allocation0 + $0x2] ss:$8 sm:$0xf]  }
   0xe   :  { %v52_v12 = vsel %vm43_vm0, %v50_v8, %v48_v10  ;;  %v68_v13 = vld [vmem:[#allocation0 + $0x1] ss:$8 sm:$0xf]   ;;  %v41_v16 = vld [vmem:[#allocation0] ss:$8 sm:$0xf]   ;;  %v62_v18 = vsel %vm43_vm0, %v60_v9, %v58_v11 }
   0xf   :  { %53 = vrot.lane.b32.xlu0 %v52_v12, %s93_s0  ;;  %v72_v15 = vsel %vm43_vm0, %v70_v14, %v68_v13  ;;  %v44_v19 = vsel %vm43_vm0, %v42_v17, %v41_v16 }
  0x10   :  { %73 = vrot.lane.b32.xlu1 %v72_v15, %s94_s22  ;;  %46 = vst.msk [vmem:[%s148_s1] sm:$0xff] %vm45_vm1, %v44_v19  }
  0x13   :  { %63 = vrot.lane.b32.xlu0 %v62_v18, %s95_s25 }
  0x81   :  { %v54_v20 = vpop.permute.xlu0 %53  }
  0x82   :  { %56 = vst.msk [vmem:[%s148_s1] sm:$0xff] %vm55_vm2, %v54_v20   ;;  %v74_v21 = vpop.permute.xlu1 %73  }
  0x85   :  { %v64_v22 = vpop.permute.xlu0 %63  }
  0x86   :  { %66 = vst.msk [vmem:[%s148_s1] sm:$0xff] %vm65_vm3, %v64_v22  }
  0x87   :  { %76 = vst.msk [vmem:[%s148_s1] sm:$0xff] %vm75_vm4, %v74_v21  }

// kernel: mul.18
= control target key start
LH: loop header
LB: loop body
LE: loop exit
PB: predicated region body
PF: predicated region fallthrough
CT: control target
= control target key end

     0   :  { %s20_s0 = inlined_call_operand.<no memory space> [shape: f32[], index: 0, kind: input, shape index: {}]   ;;  %s21_s1 = inlined_call_operand.vmem [shape: f32[32], index: 1, kind: output, shape index: {}]  }
   0x1   :  { %v2_v0 = vstv %s20_s0 }
   0x2   :  { %3 = vst [vmem:[%s21_s1] sm:$0x1] %v2_v0 }

// kernel: mul.19
= control target key start
LH: loop header
LB: loop body
LE: loop exit
PB: predicated region body
PF: predicated region fallthrough
CT: control target
= control target key end

     0   :  { %s20_s0 = inlined_call_operand.<no memory space> [shape: f32[], index: 0, kind: input, shape index: {}]   ;;  %s21_s1 = inlined_call_operand.vmem [shape: f32[1,32], index: 1, kind: output, shape index: {}]  }
   0x1   :  { %v2_v0 = vstv %s20_s0 }
   0x2   :  { %3 = vst [vmem:[%s21_s1] sm:$0x1] %v2_v0 }

// kernel: attention_forward.1
= control target key start
LH: loop header
LB: loop body
LE: loop exit
PB: predicated region body
PF: predicated region fallthrough
CT: control target
= control target key end

     0   :  { %12 = vsyncpa [#allocation3], 0  ;;  %s1805_s0 = inlined_call_operand.vmem [shape: f32[2,8,32], index: 0, kind: input, shape index: {}]   ;;  %s1806_s1 = inlined_call_operand.vmem [shape: bf16[32,160], index: 1, kind: input, shape index: {}]   ;;  %s1807_s2 = inlined_call_operand.vmem [shape: f32[1,160], index: 2, kind: input, shape index: {}]   ;;  %s1808_s3 = inlined_call_operand.vmem [shape: bf16[32,32], index: 3, kind: input, shape index: {}]   ;;  %s1809_s4 = inlined_call_operand.vmem [shape: f32[1,32], index: 4, kind: input, shape index: {}]   ;;  %s1810_s5 = inlined_call_operand.vmem [shape: f32[8,32], index: 5, kind: input, shape index: {}]   ;;  %s1811_s6 = inlined_call_operand.vmem [shape: f32[8,32], index: 6, kind: input, shape index: {}]   ;;  %s1812_s7 = inlined_call_operand.hbm [shape: f32[2,8,32], index: 7, kind: output, shape index: {}]  }
   0x1   :  { %14 = vsyncpa [#allocation3 + $0x1], 0  ;;  %s1580_s24 = smov 0   ;;  %s1582_s25 = smov 0  }
   0x2   :  { %s1584_s26 = smov 0   ;;  %s1586_s27 = smov 0  }
   0x3 LB: > { %s1601_s28 = sadd.s32 4294967295, %s1522_s27   ;;  %s1262_s29 = sadd.s32 4294967294, %s1522_s27   ;;  %s1522_s27 = sphi %s1586_s27, %s1818_s27   ;;  %s1518_s26 = sphi %s1584_s26, %s1817_s26   ;;  %s1514_s25 = sphi %s1582_s25, %s1816_s25   ;;  %s1510_s24 = sphi %s1580_s24, %s1815_s24  }
   0x4   : > { %s1605_s30 = sadd.s32 1, %s1522_s27   ;;  %s179_s8 = sadd.s32 1, %s1518_s26 }
   0x5   : > { %s176_s9 = ssub.s32 %s1522_s27, %s1605_s30  ;;  %p189_p0 = scmp.ne.s32.totalorder %s1518_s26, %s1514_s25 }
   0x6   : > { %p177_p1 = scmp.eq.s32.totalorder %s176_s9, 0  ;;  %p190_p2 = scmp.eq.s32.totalorder %s1601_s28, 1 }
   0x7   : > { %p195_p3 = scmp.ne.s32.totalorder %s1514_s25, %s1510_s24  ;;  %p196_p4 = scmp.eq.s32.totalorder %s1262_s29, 1 }
   0x8   : > { %s1616_s10 = scalar_select %p177_p1, %s1518_s26, %s179_s8  }
   0x9   : > { %p1618_p5 = por %p190_p2, %p189_p0  ;;  %p1622_p6 = por %p196_p4, %p195_p3 }
   0xa   : > { %p1265_p7 = scmp.ge.s32.totalorder %s1522_s27, 1  ;;  %p239_p8 = scmp.lt.s32.totalorder %s1522_s27, 3 }
   0xc   : > { %p240_p9 = pnand %p1265_p7, %p239_p8 }
   0xd   : > { %p270_p10 = scmp.lt.s32.totalorder (!%p240_p9), %s1601_s28, 1  ;;  %s1527_s18 = smov (!%p240_p9), 32  }
   0xe   : > { %243 = sbr.rel (%p240_p9) target bundleno = 2728 (0xaa8), region = 48  ;;  %s1530_s21 = smov (!%p240_p9), 56  }
   0xf   : > { %s1531_s22 = smov (!%p240_p9), 48   ;;  %s1532_s23 = smov (!%p240_p9), 112  }
  0x10   : > { %s1533_s29 = smov (!%p240_p9), 40   ;;  %s1534_s8 = smov (!%p240_p9), 120  }
  0x11   : > { %s1535_s9 = smov (!%p240_p9), 104   ;;  %s1538_s15 = smov (!%p240_p9), 24  }
  0x12   : > { %s267_s20 = sand.u32 (!%p240_p9), 1, %s1514_s25  }
  0x13   : > { %s271_s13 = scalar_select %p270_p10, %s1601_s28, 1  ;;  %vm277_vm0 = vcmask 261120   ;;  %v1430_v10 = vld [vmem:[%s1806_s1 + $0x14] ss:$8 sps:$4 sm:$0xff]   ;;  %v1432_v11 = vld [vmem:[%s1806_s1 + $0x10] ss:$8 sps:$4 sm:$0xff]   ;;  %v371_v33 = vlaneseq }
  0x14   : > { %v1433_v12 = vld [vmem:[%s1806_s1 + $0x4] ss:$8 sps:$4 sm:$0xff]   ;;  %338 = vmatprep.subr.bf16.mxu0 %v1430_v10  ;;  %v1524_v13 = vmov 0   ;;  %v1435_v14 = vld [vmem:[%s1806_s1] ss:$8 sps:$4 sm:$0xff]   ;;  %v1528_v32 = vmov 0.0  }
  0x15   : > { %s1267_s14 = sshll.u32 %s271_s13, 3  ;;  %358 = vmatprep.mubr.bf16.mxu0 %v1524_v13  ;;  %339 = vmatpush1.bf16.msra.mxu0 %v1432_v11  ;;  %v384_v15 = vld [vmem:[%s1811_s6] sm:$0xff]  ;;  %v1658_v34 = vshrl.u32 %v371_v33, 7  ;;  %vm1529_vm2 = vmmov 0   ;;  %vm418_vm3 = vcmask 64512   ;;  %v1681_v61 = vand.u32 127, %v371_v33 }
  0x16   : > { %s273_s17 = scalar_lea.vmem %s1805_s0, %s1267_s14  ;;  %340 = vmatprep.subr.bf16.mxu0 %v1433_v12  ;;  %s1525_s14 = smov 96   ;;  %v383_v16 = vld [vmem:[%s1810_s5] sm:$0xff]  ;;  %1317 = vmatprep.subr.mxu1 %v1528_v32  ;;  %vm1095_vm5 = vcmask 130048   ;;  %vm1097_vm6 = vcmask 195584  }
  0x17   : > { %v275_v0 = vld [vmem:[%s273_s17] sm:$0xff]  ;;  %401 = vrot.lane.b32.xlu1 %v384_v15, %s1525_s14  ;;  %s1526_s17 = smov 64   ;;  %v373_v35 = vsub.s32 0, %v1658_v34  ;;  %v377_v37 = vsub.s32 1, %v1658_v34  ;;  %1319 = vmatprep.mubr.msk.f32.mxu1 %vm1529_vm2, %v1528_v32  ;;  %vm414_vm4 = vcmp.le.s32.totalorder %v1681_v61, %v1658_v34  ;;  %s1536_s13 = smov 8  }
  0x18   : > { %v276_v1 = vmul.f32 %v275_v0, %v275_v0  ;;  %v369_v36 = vld [vmem:[%s1807_s2] sm:$0x3] }
  0x19   : > { %341 = vmatpush1.bf16.msra.mxu0 %v1435_v14  ;;  %v374_v39 = vrot.slane %v369_v36, %v373_v35  ;;  %v378_v42 = vrot.slane %v369_v36, %v377_v37 }
  0x1a   : > { %v278_v2 = vsel %vm277_vm0, %v276_v1, 0.0  ;;  %1312 = vmatprep.subr.mxu0 %v1528_v32 }
  0x1b   : > { %279 = vadd.xlane.f32.xlu0 %v278_v2  ;;  %397 = vrot.lane.b32.xlu1 %v383_v16, %s1526_s17 }
  0x1f   : > { %387 = vrot.lane.b32.xlu1 %v384_v15, %s1527_s18 }
  0x89   : > { %v402_v46 = vpop.permute.xlu1 %401 }
  0x8d   : > { %v398_v51 = vpop.permute.xlu1 %397 }
  0x91   : > { %v388_v55 = vpop.permute.xlu1 %387 }
  0xa4   : > { %v280_v3 = vpop.xlane.xlu0 %279 }
  0xa5   : > { %v282_v4 = vmul.f32 0.03125, %v280_v3 }
  0xa7   : > { %v283_v5 = vadd.f32 1e-06, %v282_v4 }
  0xa9   : > { %1438 = vrsqrt.f32 %v283_v5 }
  0xb6   : > { %v1439_v6 = vpop.eup %1438 }
  0xb7   : > { %v285_v7 = vmul.f32 %v1439_v6, %v275_v0 }
  0xb9   : > { %v286_v8 = vand.u32 2147483647, %v285_v7 }
  0xbb   : > { %v287_v9 = vsel %vm277_vm0, %v286_v8, -inf }
  0xbc   : > { %288 = vmax.xlane.f32.xlu0 %v287_v9 }
 0x145   : > { %v289_v17 = vpop.xlane.xlu0 %288 }
 0x146   : > { %v290_v18 = vmax.f32 %v289_v17, 1e-05 }
 0x148   : > { %1440 = vrcp.f32 %v290_v18  ;;  %v298_v38 = vmul.f32 0.007874016, %v290_v18 }
 0x155   : > { %v1441_v19 = vpop.eup %1440 }
 0x156   : > { %v292_v20 = vmul.f32 127.0, %v1441_v19 }
 0x158   : > { %v293_v21 = vmul.f32 %v292_v20, %v285_v7 }
 0x15a   : > { %v1362_v22 = vcvt.f32.s32 %v293_v21  ;;  %v1360_v24 = vand.u32 2147483647, %v293_v21  ;;  %v1365_v26 = vand.u32 2147483648, %v293_v21 }
 0x15c   : > { %v1363_v23 = vcvt.s32.f32 %v1362_v22  ;;  %vm1361_vm1 = vcmp.lt.f32.partialorder %v1360_v24, 8388608.0 }
 0x15e   : > { %v1364_v25 = vand.u32 2147483647, %v1363_v23 }
 0x160   : > { %v1366_v27 = vor.u32 %v1365_v26, %v1364_v25 }
 0x162   : > { %v1367_v28 = vsel %vm1361_vm1, %v1366_v27, %v293_v21 }
 0x163   : > { %v295_v29 = vmax.f32 %v1367_v28, -128.0 }
 0x165   : > { %v296_v30 = vmin.f32 %v295_v29, 127.0 }
 0x167   : > { %v297_v31 = vpack.c.bf16 %v296_v30, %v296_v30 }
 0x169   : > { %1272 = vmatmul.mubr.msk.bf16.vlgmr.msra.gmra.mxu0 %vm277_vm0, %v297_v31 }
 0x16a   : > { %1314 = vmatprep.mubr.msk.f32.mxu0 %vm1529_vm2, %v1528_v32 }
 0x229   : > { %v360_v40 = vpop.f32.mrf.mxu0 }
 0x22a   : > { %v367_v41 = vmul.f32 %v360_v40, %v298_v38 }
 0x22b   : > { %v362_v43 = vpop.f32.mrf.mxu0 }
 0x22c   : > { %v381_v44 = vmul.f32 %v374_v39, %v367_v41  ;;  %v368_v45 = vmul.f32 %v362_v43, %v298_v38 }
 0x22d   : > { %v364_v47 = vpop.f32.mrf.mxu0 }
 0x22e   : > { %v1665_v48 = vmul.f32 %v378_v42, %v368_v45  ;;  %v404_v49 = vmul.f32 %v402_v46, %v381_v44  ;;  %v400_v52 = vmul.f32 %v398_v51, %v381_v44  ;;  %v390_v56 = vmul.f32 %v388_v55, %v381_v44 }
 0x22f   : > { %v365_v50 = vpop.f32.mrf.mxu0  ;;  %v385_v58 = vmul.f32 %v383_v16, %v381_v44 }
 0x230   : > { %406 = vrot.lane.b32.xlu0 %v404_v49, %s1525_s14  ;;  %1318 = vmatpush3.msra.mxu1 %v1665_v48 }
 0x231   : > { %1322 = vmatprep.subr.mxu1 %v1528_v32 }
 0x2a2   : > { %v407_v53 = vpop.permute.xlu0 %406 }
 0x2a3   : > { %v409_v54 = vadd.f32 %v407_v53, %v400_v52 }
 0x2a5   : > { %416 = vrot.lane.b32.xlu1 %v409_v54, %s1526_s17  ;;  %s1539_s17 = smov [#allocation2]  }
 0x2a6   : > { %s1466_s18 = sshll.u32 %s1539_s17, 4  ;;  %s1467_s18 = int_to_ptr.vmem [resolvable:$false] %s1466_s18 }
 0x2a7   : > { %s1468_s19 = scalar_lea.vmem %s1467_s18, 256 }
 0x2a9   : > { %392 = vrot.lane.b32.xlu1 %v390_v56, %s1525_s14  ;;  %s1537_s14 = smov 16  }
 0x317   : > { %v417_v57 = vpop.permute.xlu1 %416 }
 0x318   : > { %1313 = vmatpush3.xpose.msk.msra.mxu0 %vm418_vm3, %v417_v57 }
 0x319   : > { %1327 = vmatprep.subr.mxu0 %v1528_v32 }
 0x31b   : > { %v393_v59 = vpop.permute.xlu1 %392 }
 0x31c   : > { %v395_v60 = vadd.f32 %v393_v59, %v385_v58 }
 0x31e   : > { %1315 = vmatmul.mubr.msk.f32.vlgmr.msra.gmra.mxu0 %vm418_vm3, %v395_v60 }
 0x31f   : > { %1329 = vmatprep.mubr.msk.f32.mxu0 %vm1529_vm2, %v1528_v32 }
 0x3de   : > { %v490_v62 = vpop.f32.mrf.mxu0 }
 0x3df   : > { %v494_v63 = vmul.f32 0.35355338, %v490_v62 }
 0x3e0   : > { %v1316_v0 = vpop.f32.mrf.mxu0 }
 0x3e1   : > { %v495_v1 = vsel %vm414_vm4, %v494_v63, -1e+30 }
 0x3e2   : > { %v496_v2 = vsel %vm418_vm3, %v495_v1, -inf }
 0x3e3   : > { %497 = vmax.xlane.f32.xlu1 %v496_v2 }
 0x3f4   : > { %582 = vrot.lane.b32.xlu1 %v409_v54, %s1530_s21  ;;  %s1266_s21 = sshll.u32 %s267_s20, 3 }
 0x3f8   : > { %750 = vrot.lane.b32.xlu1 %v409_v54, %s1531_s22 }
 0x3fc   : > { %748 = vrot.lane.b32.xlu1 %v395_v60, %s1532_s23 }
 0x400   : > { %917 = vrot.lane.b32.xlu1 %v409_v54, %s1533_s29  ;;  %s1290_s29 = sshll.u32 %s1601_s28, 7  ;;  %s1190_s28 = scalar_lea.sflag [#allocation3], %s267_s20 }
 0x46c   : > { %v498_v3 = vpop.xlane.xlu1 %497 }
 0x46d   : > { %v499_v4 = vsub.f32 %v495_v1, %v498_v3 }
 0x46f   : > { %v500_v5 = vmul.f32 1.442695, %v499_v4 }
 0x470   : > { %v583_v9 = vpop.permute.xlu1 %582 }
 0x471   : > { %1442 = vpow2.f32 %v500_v5 }
 0x474   : > { %v751_v10 = vpop.permute.xlu1 %750 }
 0x478   : > { %v749_v13 = vpop.permute.xlu1 %748 }
 0x47c   : > { %v918_v15 = vpop.permute.xlu1 %917 }
 0x47e   : > { %v1443_v6 = vpop.eup %1442 }
 0x47f   : > { %v502_v7 = vsel %vm418_vm3, %v1443_v6, 0.0 }
 0x480   : > { %503 = vadd.xlane.f32.xlu0 %v502_v7 }
 0x496   : > { %580 = vrot.lane.b32.xlu0 %v395_v60, %s1534_s8 }
 0x49a   : > { %915 = vrot.lane.b32.xlu0 %v395_v60, %s1535_s9 }
 0x509   : > { %v504_v8 = vpop.xlane.xlu0 %503 }
 0x50a   : > { %1444 = vrcp.f32 %v504_v8 }
 0x50d   : > { %v581_v14 = vpop.permute.xlu0 %580 }
 0x511   : > { %v916_v16 = vpop.permute.xlu0 %915 }
 0x517   : > { %v1445_v11 = vpop.eup %1444 }
 0x518   : > { %v506_v12 = vmul.f32 %v1445_v11, %v1443_v6 }
 0x51a   : > { %1320 = vmatmul.mubr.msk.f32.vlgmr.msra.gmra.mxu1 %vm418_vm3, %v506_v12 }
 0x51b   : > { %1323 = vmatpush3.xpose.msk.msra.mxu1 %vm418_vm3, %v583_v9  ;;  %1324 = vmatprep.mubr.msk.f32.mxu1 %vm1529_vm2, %v1528_v32 }
 0x51c   : > { %1332 = vmatprep.subr.mxu1 %v1528_v32 }
 0x51e   : > { %1325 = vmatmul.mubr.msk.f32.vlgmr.msra.gmra.mxu1 %vm418_vm3, %v581_v14 }
 0x51f   : > { %1333 = vmatpush3.xpose.msk.msra.mxu1 %vm418_vm3, %v751_v10  ;;  %1334 = vmatprep.mubr.msk.f32.mxu1 %vm1529_vm2, %v1528_v32 }
 0x520   : > { %1342 = vmatprep.subr.mxu1 %v1528_v32 }
 0x522   : > { %1335 = vmatmul.mubr.msk.f32.vlgmr.msra.gmra.mxu1 %vm418_vm3, %v749_v13 }
 0x523   : > { %1343 = vmatpush3.xpose.msk.msra.mxu1 %vm418_vm3, %v918_v15  ;;  %1344 = vmatprep.mubr.msk.f32.mxu1 %vm1529_vm2, %v1528_v32 }
 0x524   : > { %1352 = vmatprep.subr.bf16.mxu1 %v1528_v32 }
 0x526   : > { %1345 = vmatmul.mubr.msk.f32.vlgmr.msra.gmra.mxu1 %vm418_vm3, %v916_v16 }
 0x527   : > { %1356 = vmatprep.mubr.msk.bf16.mxu1 %vm1529_vm2, %v1528_v32 }
 0x5da   : > { %v1711_v17 = vpop.f32.mrf.mxu1 }
 0x5dc   : > { %v1321_v18 = vpop.f32.mrf.mxu1 }
 0x5de   : > { %v654_v19 = vpop.f32.mrf.mxu1 }
 0x5df   : > { %v658_v20 = vmul.f32 0.35355338, %v654_v19 }
 0x5e0   : > { %v1326_v21 = vpop.f32.mrf.mxu1 }
 0x5e1   : > { %v659_v22 = vsel %vm414_vm4, %v658_v20, -1e+30  ;;  %v1437_v20 = vld [vmem:[%s1808_s3] sm:$0xff]  }
 0x5e2   : > { %v822_v23 = vpop.f32.mrf.mxu1  ;;  %v660_v24 = vsel %vm418_vm3, %v659_v22, -inf }
 0x5e3   : > { %v826_v25 = vmul.f32 0.35355338, %v822_v23  ;;  %661 = vmax.xlane.f32.xlu1 %v660_v24 }
 0x5e4   : > { %v1336_v26 = vpop.f32.mrf.mxu1 }
 0x5e5   : > { %v827_v27 = vsel %vm414_vm4, %v826_v25, -1e+30 }
 0x5e6   : > { %v989_v28 = vpop.f32.mrf.mxu1  ;;  %v828_v29 = vsel %vm418_vm3, %v827_v27, -inf }
 0x5e7   : > { %v993_v30 = vmul.f32 0.35355338, %v989_v28  ;;  %829 = vmax.xlane.f32.xlu0 %v828_v29 }
 0x5e8   : > { %v1346_v31 = vpop.f32.mrf.mxu1 }
 0x5e9   : > { %v994_v33 = vsel %vm414_vm4, %v993_v30, -1e+30 }
 0x5ea   : > { %v995_v35 = vsel %vm418_vm3, %v994_v33, -inf }
 0x5eb   : > { %996 = vmax.xlane.f32.xlu0 %v995_v35 }
 0x66c   : > { %v662_v36 = vpop.xlane.xlu1 %661 }
 0x66d   : > { %v663_v37 = vsub.f32 %v659_v22, %v662_v36 }
 0x66f   : > { %v664_v38 = vmul.f32 1.442695, %v663_v37 }
 0x670   : > { %v830_v39 = vpop.xlane.xlu0 %829 }
 0x671   : > { %1446 = vpow2.f32 %v664_v38  ;;  %v831_v40 = vsub.f32 %v827_v27, %v830_v39  ;;  %v1288_v39 = vld [vmem:[%s1809_s4] ss:$0 sm:$0xff] }
 0x673   : > { %v832_v41 = vmul.f32 1.442695, %v831_v40 }
 0x674   : > { %v997_v34 = vpop.xlane.xlu0 %996 }
 0x675   : > { %1448 = vpow2.f32 %v832_v41  ;;  %v998_v46 = vsub.f32 %v994_v33, %v997_v34 }
 0x677   : > { %v999_v47 = vmul.f32 1.442695, %v998_v46 }
 0x679   : > { %1450 = vpow2.f32 %v999_v47 }
 0x67e   : > { %v1447_v42 = vpop.eup %1446 }
 0x67f   : > { %v666_v43 = vsel %vm418_vm3, %v1447_v42, 0.0 }
 0x680   : > { %667 = vadd.xlane.f32.xlu1 %v666_v43 }
 0x682   : > { %v1449_v44 = vpop.eup %1448 }
 0x683   : > { %v834_v45 = vsel %vm418_vm3, %v1449_v44, 0.0 }
 0x684   : > { %835 = vadd.xlane.f32.xlu0 %v834_v45 }
 0x686   : > { %v1451_v49 = vpop.eup %1450 }
 0x687   : > { %v1001_v50 = vsel %vm418_vm3, %v1451_v49, 0.0 }
 0x691   : > { %839 = vrot.lane.b32.xlu1 %v1665_v48, %s1532_s23 }
 0x69a   : > { %672 = vrot.lane.b32.xlu0 %v1665_v48, %s1534_s8  ;;  %s269_s8 = scalar_lea.vmem [#allocation2], %s1266_s21 }
 0x6b5   : > { %1002 = vadd.xlane.f32.xlu1 %v1001_v50 }
 0x6c6   : > { %1006 = vrot.lane.b32.xlu1 %v1665_v48, %s1535_s9  ;;  %s1203_s9 = sshll.u32 %s269_s8, 4  ;;  %s1765_s9 = int_to_ptr.vmem [resolvable:$true] %s1203_s9 }
 0x6c7   : > { %s1462_s16 = scalar_lea.vmem %s1765_s9, 128  ;;  %p1469_p0 = scmp.lt.s32.totalorder %s1765_s9, %s1467_s18 }
 0x6c8   : > { %p1463_p11 = scmp.ne.s32.totalorder %s1765_s9, %s1462_s16  ;;  %p1470_p1 = scmp.lt.s32.totalorder %s1468_s19, %s1462_s16 }
 0x6ca   : > { %p1464_p12 = pnand %p1463_p11, %p1618_p5  ;;  %p1471_p2 = por %p1470_p1, %p1469_p0 }
 0x6cc   : > { %p1465_p13 = pneg %p1464_p12 }
 0x6ce   : > { %p1472_p3 = pnand %p1471_p2, %p1465_p13 }
 0x709   : > { %v668_v51 = vpop.xlane.xlu1 %667 }
 0x70a   : > { %1452 = vrcp.f32 %v668_v51 }
 0x70d   : > { %v836_v52 = vpop.xlane.xlu0 %835  ;;  %v840_v56 = vpop.permute.xlu1 %839 }
 0x70e   : > { %1454 = vrcp.f32 %v836_v52 }
 0x711   : > { %v673_v53 = vpop.permute.xlu0 %672 }
 0x712   : > { %1328 = vmatpush3.msra.mxu0 %v673_v53 }
 0x713   : > { %1337 = vmatprep.subr.mxu0 %v1528_v32 }
 0x717   : > { %v1453_v54 = vpop.eup %1452 }
 0x718   : > { %v670_v55 = vmul.f32 %v1453_v54, %v1447_v42 }
 0x71a   : > { %1330 = vmatmul.mubr.msk.f32.vlgmr.msra.gmra.mxu0 %vm418_vm3, %v670_v55 }
 0x71b   : > { %v1455_v57 = vpop.eup %1454  ;;  %1338 = vmatpush3.msra.mxu0 %v840_v56  ;;  %1339 = vmatprep.mubr.msk.f32.mxu0 %vm1529_vm2, %v1528_v32 }
 0x71c   : > { %v838_v58 = vmul.f32 %v1455_v57, %v1449_v44  ;;  %1347 = vmatprep.subr.mxu0 %v1528_v32 }
 0x71e   : > { %1340 = vmatmul.mubr.msk.f32.vlgmr.msra.gmra.mxu0 %vm418_vm3, %v838_v58 }
 0x71f   : > { %1349 = vmatprep.mubr.msk.f32.mxu0 %vm1529_vm2, %v1528_v32 }
 0x73e   : > { %v1003_v48 = vpop.xlane.xlu1 %1002 }
 0x73f   : > { %1456 = vrcp.f32 %v1003_v48 }
 0x742   : > { %v1007_v59 = vpop.permute.xlu1 %1006 }
 0x743   : > { %1348 = vmatpush3.msra.mxu0 %v1007_v59 }
 0x74c   : > { %v1457_v60 = vpop.eup %1456 }
 0x74d   : > { %v1005_v61 = vmul.f32 %v1457_v60, %v1451_v49 }
 0x74f   : > { %1350 = vmatmul.mubr.msk.f32.vlgmr.msra.gmra.mxu0 %vm418_vm3, %v1005_v61 }
 0x7da   : > { %v744_v62 = vpop.f32.mrf.mxu0 }
 0x7db   : > { %1083 = vrot.lane.b32.xlu0 %v744_v62, %s1536_s13 }
 0x7dc   : > { %v1331_v63 = vpop.f32.mrf.mxu0 }
 0x7de   : > { %v911_v0 = vpop.f32.mrf.mxu0 }
 0x7df   : > { %1087 = vrot.lane.b32.xlu1 %v911_v0, %s1537_s14 }
 0x7e0   : > { %v1341_v1 = vpop.f32.mrf.mxu0 }
 0x80f   : > { %v1078_v2 = vpop.f32.mrf.mxu0 }
 0x810   : > { %1091 = vrot.lane.b32.xlu0 %v1078_v2, %s1538_s15  ;;  %s1763_s15 = scalar_lea.hbm %s1812_s7, %s1290_s29 }
 0x811   : > { %v1351_v3 = vpop.f32.mrf.mxu0 }
 0x84d   : > { %v1084_v4 = vpop.permute.xlu0 %1083 }
 0x84e   : > { %v1094_v6 = vsel %vm418_vm3, %v1711_v17, %v1084_v4  ;;  %v1436_v17 = vld [vmem:[%s1808_s3 + $0x8] sm:$0xff]  }
 0x84f   : > { %1353 = vmatpush3.bf16.msra.mxu1 %v1436_v17 }
 0x850   : > { %1354 = vmatprep.subr.bf16.mxu1 %v1528_v32 }
 0x851   : > { %v1088_v5 = vpop.permute.xlu1 %1087 }
 0x852   : > { %v1096_v7 = vsel %vm1095_vm5, %v1094_v6, %v1088_v5 }
 0x853   : > { %1355 = vmatpush3.bf16.msra.mxu1 %v1437_v20 }
 0x882   : > { %v1092_v8 = vpop.permute.xlu0 %1091 }
 0x883   : > { %v1098_v9 = vsel %vm1097_vm6, %v1096_v7, %v1092_v8 }
 0x884   : > { %v1099_v10 = vmul.f32 %v1098_v9, %v1098_v9 }
 0x886   : > { %v1100_v11 = vsel %vm277_vm0, %v1099_v10, 0.0 }
 0x887   : > { %1101 = vadd.xlane.f32.xlu1 %v1100_v11 }
 0x910   : > { %v1102_v12 = vpop.xlane.xlu1 %1101 }
 0x911   : > { %v1103_v13 = vmul.f32 0.03125, %v1102_v12 }
 0x913   : > { %v1104_v14 = vadd.f32 1e-06, %v1103_v13 }
 0x915   : > { %1458 = vrsqrt.f32 %v1104_v14 }
 0x922   : > { %v1459_v15 = vpop.eup %1458 }
 0x923   : > { %v1106_v16 = vmul.f32 %v1459_v15, %v1098_v9 }
 0x925   : > { %v1107_v18 = vand.u32 2147483647, %v1106_v16 }
 0x927   : > { %v1108_v19 = vsel %vm277_vm0, %v1107_v18, -inf }
 0x928   : > { %1109 = vmax.xlane.f32.xlu0 %v1108_v19 }
 0x9b1   : > { %v1110_v21 = vpop.xlane.xlu0 %1109 }
 0x9b2   : > { %v1111_v22 = vmax.f32 %v1110_v21, 1e-05 }
 0x9b4   : > { %1460 = vrcp.f32 %v1111_v22  ;;  %v1119_v37 = vmul.f32 0.007874016, %v1111_v22 }
 0x9c1   : > { %v1461_v23 = vpop.eup %1460 }
 0x9c2   : > { %v1113_v24 = vmul.f32 127.0, %v1461_v23 }
 0x9c4   : > { %v1114_v25 = vmul.f32 %v1113_v24, %v1106_v16 }
 0x9c6   : > { %v1370_v26 = vcvt.f32.s32 %v1114_v25  ;;  %v1368_v28 = vand.u32 2147483647, %v1114_v25  ;;  %v1373_v30 = vand.u32 2147483648, %v1114_v25 }
 0x9c8   : > { %v1371_v27 = vcvt.s32.f32 %v1370_v26  ;;  %vm1369_vm7 = vcmp.lt.f32.partialorder %v1368_v28, 8388608.0 }
 0x9ca   : > { %v1372_v29 = vand.u32 2147483647, %v1371_v27 }
 0x9cc   : > { %v1374_v31 = vor.u32 %v1373_v30, %v1372_v29 }
 0x9ce   : > { %v1375_v33 = vsel %vm1369_vm7, %v1374_v31, %v1114_v25 }
 0x9cf   : > { %v1116_v35 = vmax.f32 %v1375_v33, -128.0 }
 0x9d1   : > { %v1117_v36 = vmin.f32 %v1116_v35, 127.0 }
 0x9d3   : > { %v1118_v32 = vpack.c.bf16 %v1117_v36, %v1117_v36 }
 0x9d5   : > { %1357 = vmatmul.mubr.msk.bf16.vlgmr.msra.gmra.mxu1 %vm277_vm0, %v1118_v32 }
 0xa95   : > { %v1173_v38 = vpop.f32.mrf.mxu1 }
 0xa96   : > { %v1179_v40 = vmul.f32 %v1173_v38, %v1119_v37 }
 0xa97   : > { %v1358_v41 = vpop.f32.mrf.mxu1 }
 0xa98   : > { %v1187_v42 = vmul.f32 %v1288_v39, %v1179_v40 }
 0xa99   : > { %v1176_v43 = vpop.f32.mrf.mxu1 }
 0xa9a   : > { %1188 = vst.msk [vmem:[%s269_s8] sm:$0xff] %vm277_vm0, %v1187_v42 }
 0xa9b   : > { %v1359_v44 = vpop.f32.mrf.mxu1 }
 0xa9c   : > { %1475 = shalt.err (!%p1472_p3)
}
 0xa9d   : > { %s1476_s21 = scalar_lea.hbm %s1763_s15, 128  ;;  %s1480_s23 = scalar_lea.hbm %s1812_s7, 256 }
 0xa9e   : > { %p1477_p4 = scmp.ne.s32.totalorder %s1763_s15, %s1476_s21  ;;  %p1481_p9 = scmp.lt.s32.totalorder %s1763_s15, %s1812_s7 }
 0xa9f   : > { %p1482_p10 = scmp.lt.s32.totalorder %s1480_s23, %s1476_s21 }
 0xaa0   : > { %p1478_p7 = pnand %p1477_p4, %p1618_p5 }
 0xaa1   : > { %p1483_p11 = por %p1482_p10, %p1481_p9 }
 0xaa2   : > { %p1479_p8 = pneg %p1478_p7 }
 0xaa4   : > { %p1484_p12 = pnand %p1483_p11, %p1479_p8 }
 0xaa6   : > { %1487 = shalt.err (!%p1484_p12)
}
 0xaa7   : > { %1376 = dma.vmem_to_hbm [thread:$0]  (%p1618_p5), %s1765_s9, 128, %s1763_s15, %s1190_s28  }
 0xaa8 PF: > { %p1382_p13 = scmp.ge.s32.totalorder %s1522_s27, 2  ;;  %s1215_s13 = sand.u32 1, %s1510_s24  }
 0xaa9   : > { %s1216_s14 = scalar_lea.sflag [#allocation3], %s1215_s13 }
 0xaaa   : > { %p1379_p0 = pnand %p1382_p13, %p1622_p6 }
 0xaac   : > { %p1380_p1 = pneg %p1379_p0 }
 0xaae   : > { %1505 = dma.done.wait (%p1380_p1), %s1216_s14, 128  }
 0xaaf   : > { %1507 = vsyncadd (%p1380_p1), %s1216_s14, 4294967168  ;;  %p17_p2 = scmp.ge.s32.totalorder %s1605_s30, 4   ;;  %s1815_s24 = smov %s1514_s25 }
 0xab0   : > { %s1816_s25 = smov %s1518_s26  ;;  %s1817_s26 = smov %s1616_s10 }
 0xab1   : > { %s1818_s27 = smov %s1605_s30  ;;  %19 = sbr.rel (!%p17_p2) target bundleno = 3 (0x3), region = 83 }
 0xab6   :  { %1221 = vsyncpa [#allocation3], 1 }
 0xab7   :  { %1223 = vsyncpa [#allocation3 + $0x1], 1 }

</bundles_post_ra>
